<compile_context>
chip_gen: v7x
topology: tpu7x:2x2x1
jax: 0.10.0
libtpu: 0.0.40
codegen_flags: <defaults>
</compile_context>

<pallas_src>
import jax
import jax.numpy as jnp
from jax import lax
from jax.experimental import pallas as pl
from jax.experimental.pallas import tpu as pltpu


def _round_up(x, m):
    return (x + m - 1) // m * m


def _pick_tile_n(n_pad):
    """Lane-tile for the collapsed B*Hout*Wout axis (n_pad is a multiple of 128).

    Prefer large tiles (big DMAs run near HBM roofline; 256-multiples fill the
    256-wide MXU on v6e/v7x) while keeping >= 4 grid steps when there is
    enough work, so v7x's two TensorCores stay balanced.
    """
    for t in (2048, 1024, 512, 256, 128):
        if n_pad % t == 0 and n_pad // t >= 4:
            return t
    for t in (512, 256, 128):
        if n_pad % t == 0:
            return t
    return n_pad


# ----------------------------------------------------------------------------
# Pallas kernel: one (Cout_pad, K_pad) x (K_pad, N_tile) MXU GEMM per grid step.
# ----------------------------------------------------------------------------
def _wgemm_kernel(w_ref, p_ref, o_ref):
    # w_ref: (Cout_pad, K_pad)  bf16  padded filter matrix (VMEM-resident)
    # p_ref: (K_pad, N_tile)    bf16  im2col patch columns for this lane tile
    # o_ref: (Cout_pad, N_tile) f32   lane-dense output tile (unmasked vst)
    o_ref[...] = jnp.dot(w_ref[...], p_ref[...],
                         preferred_element_type=jnp.float32)


def im2col_gemm_pallas(w_mat, patches, tile_n):
    """w_mat: (C_pad, K_pad) bf16, patches: (K_pad, N_pad) bf16 -> (C_pad, N_pad) f32."""
    c_pad, k_pad = w_mat.shape
    k_pad2, n_pad = patches.shape
    assert k_pad == k_pad2 and n_pad % tile_n == 0
    n_tiles = n_pad // tile_n

    flops = 2 * c_pad * k_pad * n_pad
    bytes_accessed = (
        w_mat.size * w_mat.dtype.itemsize
        + patches.size * patches.dtype.itemsize
        + c_pad * n_pad * 4
    )

    return pl.pallas_call(
        _wgemm_kernel,
        out_shape=jax.ShapeDtypeStruct((c_pad, n_pad), jnp.float32),
        grid=(n_tiles,),
        in_specs=[
            # Constant index_map: the padded weight is fetched once and stays
            # resident in VMEM across all grid steps.
            pl.BlockSpec((c_pad, k_pad), lambda j: (0, 0)),
            pl.BlockSpec((k_pad, tile_n), lambda j: (0, j)),
        ],
        out_specs=pl.BlockSpec((c_pad, tile_n), lambda j: (0, j)),
        compiler_params=pltpu.CompilerParams(
            dimension_semantics=("parallel",),
        ),
        cost_estimate=pl.CostEstimate(
            flops=flops, transcendentals=0, bytes_accessed=bytes_accessed
        ),
    )(w_mat, patches)


# ----------------------------------------------------------------------------
# GroupKernel: deterministic C4 (rotations by 90 deg, order 4) filter bank
# ----------------------------------------------------------------------------
def sample_group_filter_bank(base_weight, group_order):
    """base_weight: (Cout, Cin, |G|, k, k) -> bank (Cout, |G|, Cin, |G|, k, k).

    bank[:, g, :, h] = rot90^g( base[:, :, (h - g) mod |G|] )
    (standard C4 group-conv filter sampling; GroupKernel itself was not given).
    """
    out_ch, in_ch, order, k, _ = base_weight.shape
    assert order == group_order
    banks = []
    for g in range(group_order):
        shifted = jnp.roll(base_weight, shift=g, axis=2)        # cyclic shift on group axis
        rotated = jnp.rot90(shifted, k=g, axes=(3, 4))          # spatial rotation by g*90 deg
        banks.append(jnp.transpose(rotated, (0, 2, 1, 3, 4)))   # (Cout, |G|, Cin, k, k)
    return jnp.stack(banks, axis=1)                             # (Cout, |G|, Cin, |G|, k, k)


# ----------------------------------------------------------------------------
# GroupConv forward (matches the PyTorch module semantics)
# ----------------------------------------------------------------------------
def group_conv_forward(x, base_weight, group_order, compute_dtype=jnp.bfloat16):
    """x: (B, in_channels, |G|, H, W) -> (B, out_channels, |G|, Hout, Wout)."""
    b, in_ch, order, h, w = x.shape
    out_ch = base_weight.shape[0]
    k = base_weight.shape[-1]
    cin_eff = in_ch * order
    cout_eff = out_ch * order
    h_out, w_out = h - k + 1, w - k + 1
    p = h_out * w_out
    n = b * p                                   # batch collapsed into the lane axis

    k_feat = k * k * cin_eff
    k_pad = _round_up(k_feat, 128)              # contraction depth (sublane dim of patches)
    c_pad = _round_up(cout_eff, 16)             # bf16 weight sublane granule (>= f32's 8)
    n_pad = _round_up(n, 128)                   # lane-dense columns, unmasked stores
    tile_n = _pick_tile_n(n_pad)

    # ---- filter bank -> padded GEMM weight (Cout_pad, K_pad); cols = (kh,kw,i)
    bank = sample_group_filter_bank(base_weight, group_order)
    w_oihw = bank.reshape(cout_eff, cin_eff, k, k)
    w_mat = jnp.transpose(w_oihw, (0, 2, 3, 1)).reshape(cout_eff, k_feat)
    w_mat = jnp.pad(w_mat.astype(compute_dtype),
                    ((0, c_pad - cout_eff), (0, k_pad - k_feat)))

    # ---- wrapper-side im2col: cast to bf16 FIRST, then one tiny pre-transpose
    # of the raw activation to (Cin_eff, B, H, W) so the k*k-inflated patch
    # blob is built directly in its GEMM layout (rows = (kh,kw,i), cols = b*P+p)
    # and neither it nor the padded output ever needs a transpose.
    x_cbhw = jnp.transpose(
        x.reshape(b, cin_eff, h, w).astype(compute_dtype), (1, 0, 2, 3))
    taps = jnp.stack(
        [x_cbhw[:, :, kh:kh + h_out, kw:kw + w_out]
         for kh in range(k) for kw in range(k)],
        axis=0)                                              # (k*k, Cin_eff, B, Hout, Wout)
    patches = taps.reshape(k_feat, n)
    patches = jnp.pad(patches, ((0, k_pad - k_feat), (0, n_pad - n)))

    # ---- Pallas GEMM (f32 accumulation), then strip padding ----
    out = im2col_gemm_pallas(w_mat, patches, tile_n)         # (Cout_pad, N_pad) f32
    out = out[:cout_eff, :n].reshape(cout_eff, b, h_out, w_out)
    out = jnp.transpose(out, (1, 0, 2, 3))                   # tiny, un-padded tensor
    return out.reshape(b, out_ch, order, h_out, w_out)


if __name__ == "__main__":
    key = jax.random.PRNGKey(0)
    k_x, k_w = jax.random.split(key)

    # Small shapes: batch=2, in_channels=2, out_channels=3, group order=4,
    # kernel_size=3, spatial 16x16.
    B, IN_CH, OUT_CH, ORDER, K, H, W = 2, 2, 3, 4, 3, 16, 16

    x = jax.random.normal(k_x, (B, IN_CH, ORDER, H, W), dtype=jnp.float32)
    base_weight = jax.random.normal(k_w, (OUT_CH, IN_CH, ORDER, K, K), dtype=jnp.float32)

    out = group_conv_forward(x, base_weight, ORDER)
    out = jax.block_until_ready(out)
    H_OUT, W_OUT = H - K + 1, W - K + 1
    assert out.shape == (B, OUT_CH, ORDER, H_OUT, W_OUT), out.shape

    # Cross-check against XLA's conv on the same bf16-rounded inputs
    # (the kernel feeds bf16 to the MXU with f32 accumulation).
    bank = sample_group_filter_bank(base_weight, ORDER)
    w_oihw = bank.reshape(OUT_CH * ORDER, IN_CH * ORDER, K, K)
    x_b = x.astype(jnp.bfloat16).astype(jnp.float32)
    w_b = w_oihw.astype(jnp.bfloat16).astype(jnp.float32)
    ref = lax.conv_general_dilated(
        x_b.reshape(B, IN_CH * ORDER, H, W), w_b,
        window_strides=(1, 1), padding="VALID",
        dimension_numbers=("NCHW", "OIHW", "NCHW"),
        precision=lax.Precision.HIGHEST,
    ).reshape(B, OUT_CH, ORDER, H_OUT, W_OUT)
    max_err = float(jnp.max(jnp.abs(out - ref)))
    assert jnp.allclose(out, ref, atol=2e-3, rtol=2e-3), max_err

    print("KERNEL_OK")
</pallas_src>

<mosaic_0001>
module attributes {stable_mosaic.version = 11 : i64} {
  func.func @_wgemm_kernel(%arg0: i32, %arg1: memref<16x128xbf16, #tpu.memory_space<vmem>>, %arg2: memref<128x128xbf16, #tpu.memory_space<vmem>>, %arg3: memref<16x128xf32, #tpu.memory_space<vmem>>) attributes {dimension_semantics = [#tpu.dimension_semantics<parallel>], iteration_bounds = array<i64: 4>, scalar_prefetch = 0 : i64, scratch_operands = 0 : i64, tpu.core_type = #tpu.core_type<tc>, window_params = [{pipeline_mode = #tpu.pipeline_mode<synchronous>, transform_indices = @transform_0, window_bounds = array<i64: 16, 128>}, {transform_indices = @transform_1, window_bounds = array<i64: 128, 128>}, {transform_indices = @transform_2, window_bounds = array<i64: 16, 128>}]} {
    %c0 = arith.constant 0 : index
    %c0_0 = arith.constant 0 : index
    %0 = vector.load %arg1[%c0, %c0_0] : memref<16x128xbf16, #tpu.memory_space<vmem>>, vector<16x128xbf16>
    %c0_1 = arith.constant 0 : index
    %c0_2 = arith.constant 0 : index
    %1 = vector.load %arg2[%c0_1, %c0_2] : memref<128x128xbf16, #tpu.memory_space<vmem>>, vector<128x128xbf16>
    %cst = arith.constant dense<0.000000e+00> : vector<16x128xf32>
    %2 = tpu.matmul %0, %1, %cst {dimension_numbers = #tpu.dot_dimension_numbers<[1], [0], [0], [1], [0, 0, 1, 1], [], []>} : vector<16x128xbf16>, vector<128x128xbf16>, vector<16x128xf32> -> vector<16x128xf32>
    %c0_3 = arith.constant 0 : index
    %c0_4 = arith.constant 0 : index
    %3 = vector.load %arg3[%c0_3, %c0_4] : memref<16x128xf32, #tpu.memory_space<vmem>>, vector<16x128xf32>
    tpu.vector_store %arg3[%c0_3, %c0_4], %2 {strides = array<i32>} : memref<16x128xf32, #tpu.memory_space<vmem>>, vector<16x128xf32>,
    return
  }
  func.func @transform_0(%arg0: i32) -> (i32, i32) {
    %c0_i32 = arith.constant 0 : i32
    %c0_i32_0 = arith.constant 0 : i32
    %c0_i32_1 = arith.constant 0 : i32
    return %c0_i32, %c0_i32_0 : i32, i32
  }
  func.func @transform_1(%arg0: i32) -> (i32, i32) {
    %c0_i32 = arith.constant 0 : i32
    %c0_i32_0 = arith.constant 0 : i32
    return %c0_i32, %arg0 : i32, i32
  }
  func.func @transform_2(%arg0: i32) -> (i32, i32) {
    %c0_i32 = arith.constant 0 : i32
    %c0_i32_0 = arith.constant 0 : i32
    return %c0_i32, %arg0 : i32, i32
  }
}

</mosaic_0001>

<bundles_post_ra>
// kernel: tpu_custom_call.1
= control target key start
LH: loop header
LB: loop body
LE: loop exit
PB: predicated region body
PF: predicated region fallthrough
CT: control target
= control target key end

     0   :  { %7 = vsyncpa [#allocation3], 0  ;;  %s876_s0 = inlined_call_operand.hbm [shape: bf16[16,128], index: 0, kind: input, shape index: {}]   ;;  %s877_s1 = inlined_call_operand.hbm [shape: bf16[128,512], index: 1, kind: input, shape index: {}]   ;;  %s878_s2 = inlined_call_operand.hbm [shape: f32[16,512], index: 2, kind: output, shape index: {}]  }
   0x1   :  { %8 = vsyncpa [#allocation6], 0 }
   0x2   :  { %10 = vsyncpa [#allocation6 + $0x1], 0 }
   0x3   :  { %11 = vsyncpa [#allocation4], 0 }
   0x4   :  { %13 = vsyncpa [#allocation4 + $0x1], 0  ;;  %s672_s9 = smov 0   ;;  %s674_s10 = smov 0  }
   0x5   :  { %s676_s11 = smov 0   ;;  %s678_s12 = smov 0  }
   0x6 LB: > { %s693_s13 = sadd.s32 4294967295, %s644_s12   ;;  %s390_s14 = sadd.s32 4294967294, %s644_s12   ;;  %s644_s12 = sphi %s678_s12, %s901_s12   ;;  %s640_s11 = sphi %s676_s11, %s900_s11   ;;  %s636_s10 = sphi %s674_s10, %s899_s10   ;;  %s632_s9 = sphi %s672_s9, %s898_s9  }
   0x7   : > { %s697_s15 = sadd.s32 1, %s644_s12   ;;  %s47_s16 = sadd.s32 1, %s640_s11 }
   0x8   : > { %s44_s17 = ssub.s32 %s644_s12, %s697_s15  ;;  %p54_p0 = scmp.ne.s32.totalorder %s640_s11, %s636_s10 }
   0x9   : > { %p45_p1 = scmp.eq.s32.totalorder %s44_s17, 0  ;;  %p55_p2 = scmp.eq.s32.totalorder %s644_s12, 0 }
   0xa   : > { %p60_p3 = scmp.ne.s32.totalorder %s636_s10, %s632_s9  ;;  %p879_p4 = scmp.eq.s32.totalorder %s693_s13, 0 }
   0xb   : > { %s709_s18 = scalar_select %p45_p1, %s640_s11, %s47_s16  }
   0xc   : > { %p711_p5 = por %p55_p2, %p54_p0  ;;  %p717_p6 = por %p879_p4, %p60_p3 }
   0xd   : > { %p84_p7 = scmp.eq.s32.totalorder %s693_s13, 3  ;;  %p90_p8 = scmp.eq.s32.totalorder %s390_s14, 3 }
   0xe   : > { %s883_s19 = scalar_select %p711_p5, 1, 0 }
   0xf   : > { %s884_s20 = scalar_select %p717_p6, 1, 0 }
  0x10   : > { %p391_p9 = scmp.ge.s32.totalorder %s644_s12, 1  ;;  %p97_p10 = scmp.lt.s32.totalorder %s644_s12, 5 }
  0x11   : > { %p724_p11 = por %p84_p7, %p54_p0  ;;  %p728_p12 = por %p90_p8, %p60_p3 }
  0x12   : > { %p732_p13 = pnand %p391_p9, %p97_p10  ;;  %s646_s24 = smov [#allocation2]  }
  0x13   : > { %s885_s21 = scalar_select %p724_p11, 1, 0 }
  0x14   : > { %s886_s22 = scalar_select %p728_p12, 1, 0 }
  0x15   : > { %s887_s23 = scalar_select %p732_p13, 1, 0 }
  0x16   : > { %p450_p1 = pneg %p732_p13  ;;  %s109_s25 = sshll.u32 %s646_s24, 4  ;;  %s110_s25 = int_to_ptr.vmem [resolvable:$true] %s109_s25 }
  0x17   : > { %s123_s27 = sand.u32 1, %s640_s11   ;;  %s516_s30 = scalar_lea.hbm %s876_s0, 128 }
  0x18   : > { %p740_p2 = pnand %p450_p1, %p879_p4  ;;  %p517_p3 = scmp.ne.s32.totalorder %s876_s0, %s516_s30 }
  0x19   : > { %p523_p10 = scmp.lt.u32.totalorder %s516_s30, %s876_s0 }
  0x1a   : > { %p518_p7 = pneg %p740_p2 }
  0x1c   : > { %p519_p8 = pnand %p518_p7, %p517_p3 }
  0x1e   : > { %p520_p9 = pneg %p519_p8 }
  0x20   : > { %p525_p1 = pnand %p523_p10, %p520_p9 }
  0x22   : > { %528 = shalt.err (!%p525_p1)
}
  0x23   : > { %s529_s7 = scalar_lea.vmem %s110_s25, 128  ;;  %p537_p11 = scmp.lt.s32.totalorder %s110_s25, %s110_s25 }
  0x24   : > { %p530_p4 = scmp.ne.s32.totalorder %s110_s25, %s529_s7  ;;  %p538_p6 = scmp.lt.s32.totalorder %s529_s7, %s529_s7 }
  0x26   : > { %p532_p0 = pnand %p530_p4, %p518_p7  ;;  %p539_p13 = por %p538_p6, %p537_p11 }
  0x28   : > { %p533_p12 = pneg %p532_p0 }
  0x2a   : > { %p540_p5 = pnand %p539_p13, %p533_p12 }
  0x2c   : > { %543 = shalt.err (!%p540_p5)
}
  0x2d   : > { %s647_s8 = smov 64   ;;  %s648_s14 = smov 4  }
  0x2e   : > { %453 = dma.hbm_to_vmem [thread:$0]  (!%p740_p2), %s876_s0, 128, %s110_s25, [#allocation3], %s647_s8, %s647_s8, %s648_s14  }
  0x2f   : > { %p889_p4 = scmp.ne.s32.totalorder %s883_s19, 0  ;;  %p890_p0 = scmp.lt.s32.totalorder %s644_s12, 4 }
  0x30   : > { %s394_s28 = sshll.u32 %s123_s27, 6  ;;  %s395_s29 = sshll.u32 %s644_s12, 6 }
  0x31   : > { %p769_p3 = pnand %p890_p0, %p889_p4  ;;  %s777_s26 = scalar_lea.hbm %s877_s1, %s395_s29 }
  0x32   : > { %s127_s25 = scalar_lea.vmem [#allocation5], %s394_s28  ;;  %s781_s4 = scalar_lea.sflag [#allocation6], %s123_s27 }
  0x33   : > { %s133_s19 = sshll.u32 %s127_s25, 4  ;;  %s544_s5 = scalar_lea.hbm %s777_s26, 1024  ;;  %s779_s19 = int_to_ptr.vmem [resolvable:$true] %s133_s19 }
  0x34   : > { %p545_p5 = scmp.ne.s32.totalorder %s777_s26, %s544_s5  ;;  %p546_p6 = pneg %p769_p3 }
  0x35   : > { %s549_s16 = scalar_lea.hbm %s877_s1, 4096  ;;  %p550_p13 = scmp.lt.u32.totalorder %s777_s26, %s877_s1 }
  0x36   : > { %p547_p11 = pnand %p546_p6, %p545_p5  ;;  %p551_p2 = scmp.lt.u32.totalorder %s549_s16, %s544_s5 }
  0x37   : > { %p553_p8 = scmp.lt.u32.totalorder %s544_s5, %s777_s26 }
  0x38   : > { %p548_p12 = pneg %p547_p11  ;;  %p552_p7 = por %p551_p2, %p550_p13 }
  0x3a   : > { %p554_p9 = por %p553_p8, %p552_p7 }
  0x3c   : > { %p555_p10 = pnand %p554_p9, %p548_p12 }
  0x3e   : > { %558 = shalt.err (!%p555_p10)
}
  0x3f   : > { %s559_s27 = scalar_lea.vmem %s779_s19, 1024  ;;  %s649_s28 = smov [#allocation5]  }
  0x40   : > { %p560_p1 = scmp.ne.s32.totalorder %s779_s19, %s559_s27  ;;  %s564_s30 = sshll.u32 %s649_s28, 4  ;;  %s565_s30 = int_to_ptr.vmem [resolvable:$false] %s564_s30 }
  0x41   : > { %s566_s3 = scalar_lea.vmem %s565_s30, 2048  ;;  %p567_p5 = scmp.lt.s32.totalorder %s779_s19, %s565_s30 }
  0x42   : > { %p562_p4 = pnand %p560_p1, %p546_p6  ;;  %p568_p11 = scmp.lt.s32.totalorder %s566_s3, %s559_s27 }
  0x44   : > { %p563_p0 = pneg %p562_p4  ;;  %p569_p13 = por %p568_p11, %p567_p5 }
  0x46   : > { %p570_p2 = pnand %p569_p13, %p563_p0 }
  0x48   : > { %573 = shalt.err (!%p570_p2)
}
  0x49   : > { %s650_s25 = smov 256   ;;  %p892_p6 = scmp.ne.s32.totalorder %s887_s23, 0 }
  0x4a   : > { %457 = dma.hbm_to_vmem [thread:$0]  (!%p769_p3), %s777_s26, 1024, %s779_s19, %s781_s4, %s650_s25, %s647_s8, %s648_s14  }
  0x4b   : > { %145 = sbr.rel (%p892_p6) target bundleno = 350 (0x15e), region = 28  ;;  %p893_p12 = scmp.eq.s32.totalorder (!%p892_p6), %s693_s13, 0 }
  0x52   : > { %619 = dma.done.wait (%p893_p12), [#allocation3], 128   ;;  %p894_p7 = pmov %p893_p12 }
  0x53   : > { %s818_s5 = sand.u32 1, %s636_s10   ;;  %p895_p8 = scmp.ne.s32.totalorder %s884_s20, 0 }
  0x54   : > { %621 = vsyncadd (%p894_p7), [#allocation3], 4294967168  ;;  %s398_s24 = sshll.u32 %s818_s5, 6  ;;  %s152_s6 = scalar_lea.sflag [#allocation6], %s818_s5 }
  0x55   : > { %s155_s7 = scalar_lea.vmem [#allocation5], %s398_s24 }
  0x56   : > { %623 = dma.done.wait (%p895_p8), %s152_s6, 1024  }
  0x57   : > { %625 = vsyncadd (%p895_p8), %s152_s6, 4294966272  ;;  %v651_v0 = vmov 0.0   ;;  %vm652_vm0 = vmmov 0   ;;  %v507_v1 = vld [vmem:[%s155_s7] sm:$0xff]   ;;  %v508_v2 = vld [vmem:[%s155_s7 + $0x8] sm:$0xff]   ;;  %s399_s20 = sshll.u32 %s818_s5, 4 }
  0x58   : > { %422 = vmatprep.subr.bf16.mxu0 %v651_v0  ;;  %438 = vmatprep.mubr.msk.bf16.mxu0 %vm652_vm0, %v651_v0  ;;  %v509_v3 = vld [vmem:[%s155_s7 + $0x10] sm:$0xff]   ;;  %v510_v4 = vld [vmem:[%s155_s7 + $0x18] sm:$0xff]   ;;  %v511_v5 = vld [vmem:[%s155_s7 + $0x20] sm:$0xff]   ;;  %s175_s23 = scalar_lea.vmem [#allocation7], %s399_s20  ;;  %s410_s14 = sshll.u32 %s693_s13, 7 }
  0x59   : > { %423 = vmatpush3.bf16.msra.mxu0 %v507_v1  ;;  %v512_v6 = vld [vmem:[%s155_s7 + $0x28] sm:$0xff]   ;;  %v513_v7 = vld [vmem:[%s155_s7 + $0x30] sm:$0xff]   ;;  %v514_v8 = vld [vmem:[%s155_s7 + $0x38] sm:$0xff]   ;;  %s305_s8 = sshll.u32 %s175_s23, 4  ;;  %s833_s4 = scalar_lea.hbm %s878_s2, %s410_s14  ;;  %s828_s8 = int_to_ptr.vmem [resolvable:$true] %s305_s8 }
  0x5a   : > { %424 = vmatprep.subr.bf16.mxu0 %v651_v0  ;;  %v515_v9 = vld [vmem:[#allocation2] sm:$0xff]   ;;  %s293_s16 = scalar_lea.sflag [#allocation4], %s818_s5  ;;  %s574_s17 = scalar_lea.vmem %s828_s8, 256 }
  0x5b   : > { %p575_p3 = scmp.ne.s32.totalorder %s828_s8, %s574_s17  ;;  %p896_p9 = scmp.ne.s32.totalorder %s885_s21, 0 }
  0x5c   : > { %s653_s13 = smov [#allocation7]  }
  0x5d   : > { %425 = vmatpush3.bf16.msra.mxu0 %v508_v2  ;;  %p576_p10 = pnand %p575_p3, %p896_p9  ;;  %s578_s29 = sshll.u32 %s653_s13, 4  ;;  %s579_s29 = int_to_ptr.vmem [resolvable:$false] %s578_s29 }
  0x5e   : > { %426 = vmatprep.subr.bf16.mxu0 %v651_v0  ;;  %s580_s27 = scalar_lea.vmem %s579_s29, 512  ;;  %p581_p4 = scmp.lt.s32.totalorder %s828_s8, %s579_s29 }
  0x5f   : > { %p577_p1 = pneg %p576_p10  ;;  %p582_p0 = scmp.lt.s32.totalorder %s580_s27, %s574_s17 }
  0x61   : > { %427 = vmatpush3.bf16.msra.mxu0 %v509_v3  ;;  %p583_p5 = por %p582_p0, %p581_p4 }
  0x62   : > { %428 = vmatprep.subr.bf16.mxu0 %v651_v0 }
  0x63   : > { %p584_p11 = pnand %p583_p5, %p577_p1 }
  0x65   : > { %429 = vmatpush3.bf16.msra.mxu0 %v510_v4 }
  0x66   : > { %430 = vmatprep.subr.bf16.mxu0 %v651_v0 }
  0x69   : > { %431 = vmatpush3.bf16.msra.mxu0 %v511_v5 }
  0x6a   : > { %432 = vmatprep.subr.bf16.mxu0 %v651_v0 }
  0x6d   : > { %433 = vmatpush3.bf16.msra.mxu0 %v512_v6 }
  0x6e   : > { %434 = vmatprep.subr.bf16.mxu0 %v651_v0 }
  0x71   : > { %435 = vmatpush3.bf16.msra.mxu0 %v513_v7 }
  0x72   : > { %436 = vmatprep.subr.bf16.mxu0 %v651_v0 }
  0x75   : > { %437 = vmatpush3.bf16.msra.mxu0 %v514_v8 }
  0x78   : > { %439 = vmatmul.mubr.bf16.vlgmr.msra.gmra.mrb[0].mxu0 %v515_v9 }
 0x14b   : > { %v283_v10 = vpop.f32.mrb[0].mxu0 }
 0x14c   : > { %290 = vst [vmem:[%s175_s23] sm:$0xff] %v283_v10  ;;  %v440_v11 = vpop.f32.mrb[1].mxu0 }
 0x14d   : > { %v286_v12 = vpop.f32.mrb[2].mxu0 }
 0x14e   : > { %291 = vst [vmem:[%s175_s23 + $0x8] sm:$0xff] %v286_v12  ;;  %v441_v13 = vpop.f32.mrb[3].mxu0 }
 0x14f   : > { %587 = shalt.err (!%p584_p11)
}
 0x150   : > { %s588_s28 = scalar_lea.hbm %s833_s4, 256  ;;  %s592_s25 = scalar_lea.hbm %s878_s2, 1024 }
 0x151   : > { %p589_p13 = scmp.ne.s32.totalorder %s833_s4, %s588_s28  ;;  %p593_p12 = scmp.lt.u32.totalorder %s833_s4, %s878_s2 }
 0x152   : > { %p594_p7 = scmp.lt.u32.totalorder %s592_s25, %s588_s28  ;;  %p596_p3 = scmp.lt.u32.totalorder %s588_s28, %s833_s4 }
 0x153   : > { %p590_p2 = pnand %p589_p13, %p896_p9 }
 0x154   : > { %p595_p8 = por %p594_p7, %p593_p12 }
 0x155   : > { %p591_p6 = pneg %p590_p2 }
 0x156   : > { %p597_p10 = por %p596_p3, %p595_p8 }
 0x158   : > { %p598_p1 = pnand %p597_p10, %p591_p6 }
 0x15a   : > { %601 = shalt.err (!%p598_p1)
}
 0x15b   : > { %s654_s7 = smov 128   ;;  %s655_s20 = smov 512  }
 0x15c   : > { %s656_s23 = smov 8  }
 0x15d   : > { %448 = dma.vmem_to_hbm [thread:$0]  (%p896_p9), %s828_s8, 256, %s833_s4, %s293_s16, %s654_s7, %s655_s20, %s656_s23  }
 0x15e PF: > { %p465_p4 = scmp.ge.s32.totalorder %s644_s12, 2  ;;  %s320_s14 = sand.u32 1, %s632_s9  }
 0x15f   : > { %p897_p0 = scmp.ne.s32.totalorder %s886_s22, 0  ;;  %s321_s26 = scalar_lea.sflag [#allocation4], %s320_s14 }
 0x161   : > { %p459_p5 = pnand %p465_p4, %p897_p0 }
 0x163   : > { %627 = dma.done.wait (!%p459_p5), %s321_s26, 256  }
 0x164   : > { %629 = vsyncadd (!%p459_p5), %s321_s26, 4294967040  ;;  %p16_p11 = scmp.ge.s32.totalorder %s697_s15, 6   ;;  %s898_s9 = smov %s636_s10 }
 0x165   : > { %s899_s10 = smov %s640_s11  ;;  %s900_s11 = smov %s709_s18 }
 0x166   : > { %s901_s12 = smov %s697_s15  ;;  %18 = sbr.rel (!%p16_p11) target bundleno = 6 (0x6), region = 78 }
 0x16d   :  { %326 = vsyncpa [#allocation3], 1 }
 0x16e   :  { %328 = vsyncpa [#allocation3 + $0x1], 1 }
 0x16f   :  { %329 = vsyncpa [#allocation6], 1 }
 0x170   :  { %331 = vsyncpa [#allocation6 + $0x1], 1 }
 0x171   :  { %332 = vsyncpa [#allocation4], 1 }
 0x172   :  { %334 = vsyncpa [#allocation4 + $0x1], 1 }

</bundles_post_ra>
